<compile_context>
chip_gen: v7x
topology: tpu7x:2x2x1
jax: 0.10.0
libtpu: 0.0.40
codegen_flags: <defaults>
</compile_context>

<pallas_src>
import jax
import jax.numpy as jnp
from jax.experimental import pallas as pl
from jax.experimental.pallas import tpu as pltpu


def _pos_enc_kernel(x_ref, w1_ref, b1_ref, w2_ref, b2_ref,
                    out_feat_ref, out_pt_ref):
    xb = x_ref[...]                                      # (tm, 2 + D)
    pos0 = xb[:, 0:1].astype(jnp.float32)                # (tm, 1)
    pos1 = xb[:, 1:2].astype(jnp.float32)                # (tm, 1)
    feat = xb[:, 2:].astype(jnp.float32)                 # (tm, D) lane-shift (XLU)

    w1 = w1_ref[...].astype(jnp.float32)                 # (2, D)
    b1 = b1_ref[...].astype(jnp.float32)                 # (1, D)
    w2 = w2_ref[...].astype(jnp.float32)                 # (D, D)
    b2 = b2_ref[...].astype(jnp.float32)                 # (1, D)

    # First Linear(2, D): contraction depth is only 2, so do it as two
    # broadcast multiplies + add on the VPU instead of a padded MXU pass.
    h = jnp.maximum(pos0 * w1[0:1, :] + pos1 * w1[1:2, :] + b1, 0.0)

    # Second Linear(D, D): real matmul on the MXU, f32 accumulation.
    pt = jnp.dot(h, w2, preferred_element_type=jnp.float32) + b2

    out_pt_ref[...] = pt.astype(out_pt_ref.dtype)
    out_feat_ref[...] = (feat + pt).astype(out_feat_ref.dtype)


def _round_up(v, m):
    return ((v + m - 1) // m) * m


def _pick_tile(M, D, itemsize):
    """Largest row tile that fits a conservative VMEM budget."""
    sub = max(8, 32 // itemsize)                 # sublane packing granularity
    # Double-buffered x block + two double-buffered output blocks, per row:
    per_row = itemsize * (2 * (2 + D) + 4 * D)
    # Resident weights/biases (double-buffered by the pipeline), f32:
    const = 2 * 4 * (D * D + 4 * D)
    target = 20 * 1024 * 1024                    # stay well inside scoped VMEM
    tm = max(sub, ((target - const) // per_row) // sub * sub)
    tm = min(tm, 2048, _round_up(M, sub))
    # Keep >= 2 grid steps when possible so the parallel grid axis can be
    # split across the 2 TensorCores on v7x.
    if M > sub and pl.cdiv(M, tm) < 2:
        tm = max(sub, _round_up(pl.cdiv(M, 2), sub))
    return tm, sub


def positional_encoding(x, w1, b1, w2, b2, *, tm=None):
    """x: (B, N, 2 + D). Returns (feat + pos_table, pos_table), each (B, N, D)."""
    B, N, C = x.shape
    D = w1.shape[1]
    assert C == 2 + D, f"expected last dim = 2 + d_hid, got {C} vs d_hid={D}"
    M = B * N
    itemsize = jnp.dtype(x.dtype).itemsize

    if tm is None:
        tm, _ = _pick_tile(M, D, itemsize)
    else:
        sub = max(8, 32 // itemsize)
        tm = max(sub, _round_up(tm, sub))

    grid_m = pl.cdiv(M, tm)

    xf = x.reshape(M, C)                          # contiguous -> free reshape
    b1_2d = b1.reshape(1, D)
    b2_2d = b2.reshape(1, D)

    cost = pl.CostEstimate(
        flops=2 * M * D * D + 4 * M * D,
        transcendentals=0,
        bytes_accessed=M * C * itemsize + 2 * M * D * itemsize
                       + 4 * (D * D + 4 * D),
    )

    out_shapes = (
        jax.ShapeDtypeStruct((M, D), x.dtype),
        jax.ShapeDtypeStruct((M, D), x.dtype),
    )

    out_feat, pos_table = pl.pallas_call(
        _pos_enc_kernel,
        out_shape=out_shapes,
        grid_spec=pltpu.PrefetchScalarGridSpec(
            num_scalar_prefetch=0,
            grid=(grid_m,),
            in_specs=[
                pl.BlockSpec((tm, C), lambda i: (i, 0)),   # x rows (pos + feat)
                pl.BlockSpec((2, D), lambda i: (0, 0)),    # W1 (resident)
                pl.BlockSpec((1, D), lambda i: (0, 0)),    # b1
                pl.BlockSpec((D, D), lambda i: (0, 0)),    # W2 (resident)
                pl.BlockSpec((1, D), lambda i: (0, 0)),    # b2
            ],
            out_specs=[
                pl.BlockSpec((tm, D), lambda i: (i, 0)),   # feat + pos_table
                pl.BlockSpec((tm, D), lambda i: (i, 0)),   # pos_table
            ],
        ),
        compiler_params=pltpu.CompilerParams(
            dimension_semantics=("parallel",),
            vmem_limit_bytes=32 * 1024 * 1024),
        cost_estimate=cost,
    )(xf, w1, b1_2d, w2, b2_2d)

    return out_feat.reshape(B, N, D), pos_table.reshape(B, N, D)


def _reference(x, w1, b1, w2, b2):
    pos = x[:, :, 0:2]
    feat = x[:, :, 2:]
    h = jnp.maximum(pos @ w1 + b1, 0.0)
    pt = h @ w2 + b2
    return feat + pt, pt


if __name__ == "__main__":
    B, N, D = 2, 8, 32          # batch, seq, d_hid
    key = jax.random.PRNGKey(0)
    kx, k1, k2, k3, k4 = jax.random.split(key, 5)

    # Deterministic inputs / parameters (Linear(2, D) and Linear(D, D)).
    x = jax.random.normal(kx, (B, N, 2 + D), dtype=jnp.float32)
    w1 = jax.random.normal(k1, (2, D), dtype=jnp.float32) * 0.5
    b1 = jax.random.normal(k2, (D,), dtype=jnp.float32) * 0.1
    w2 = jax.random.normal(k3, (D, D), dtype=jnp.float32) * 0.1
    b2 = jax.random.normal(k4, (D,), dtype=jnp.float32) * 0.1

    out_feat, pos_table = positional_encoding(x, w1, b1, w2, b2)
    jax.block_until_ready((out_feat, pos_table))

    ref_feat, ref_pt = _reference(x, w1, b1, w2, b2)
    assert out_feat.shape == (B, N, D) and pos_table.shape == (B, N, D)
    assert jnp.allclose(out_feat, ref_feat, atol=1e-5, rtol=1e-5)
    assert jnp.allclose(pos_table, ref_pt, atol=1e-5, rtol=1e-5)

    print("KERNEL_OK")
</pallas_src>

<mosaic_0001>
module attributes {stable_mosaic.version = 11 : i64} {
  func.func @_pos_enc_kernel(%arg0: i32, %arg1: memref<8x34xf32, #tpu.memory_space<vmem>>, %arg2: memref<2x32xf32, #tpu.memory_space<vmem>>, %arg3: memref<1x32xf32, #tpu.memory_space<vmem>>, %arg4: memref<32x32xf32, #tpu.memory_space<vmem>>, %arg5: memref<1x32xf32, #tpu.memory_space<vmem>>, %arg6: memref<8x32xf32, #tpu.memory_space<vmem>>, %arg7: memref<8x32xf32, #tpu.memory_space<vmem>>) attributes {dimension_semantics = [#tpu.dimension_semantics<parallel>], iteration_bounds = array<i64: 2>, scalar_prefetch = 0 : i64, scratch_operands = 0 : i64, tpu.core_type = #tpu.core_type<tc>, window_params = [{transform_indices = @transform_0, window_bounds = array<i64: 8, 34>}, {pipeline_mode = #tpu.pipeline_mode<synchronous>, transform_indices = @transform_1, window_bounds = array<i64: 2, 32>}, {pipeline_mode = #tpu.pipeline_mode<synchronous>, transform_indices = @transform_2, window_bounds = array<i64: 1, 32>}, {pipeline_mode = #tpu.pipeline_mode<synchronous>, transform_indices = @transform_3, window_bounds = array<i64: 32, 32>}, {pipeline_mode = #tpu.pipeline_mode<synchronous>, transform_indices = @transform_4, window_bounds = array<i64: 1, 32>}, {transform_indices = @transform_5, window_bounds = array<i64: 8, 32>}, {transform_indices = @transform_6, window_bounds = array<i64: 8, 32>}]} {
    %c0 = arith.constant 0 : index
    %c0_0 = arith.constant 0 : index
    %0 = vector.load %arg1[%c0, %c0_0] : memref<8x34xf32, #tpu.memory_space<vmem>>, vector<8x34xf32>
    %1 = vector.extract_strided_slice %0 {offsets = [0, 0], sizes = [8, 1], strides = [1, 1]} : vector<8x34xf32> to vector<8x1xf32>
    %2 = vector.extract_strided_slice %0 {offsets = [0, 1], sizes = [8, 1], strides = [1, 1]} : vector<8x34xf32> to vector<8x1xf32>
    %3 = vector.extract_strided_slice %0 {offsets = [0, 2], sizes = [8, 32], strides = [1, 1]} : vector<8x34xf32> to vector<8x32xf32>
    %c0_1 = arith.constant 0 : index
    %c0_2 = arith.constant 0 : index
    %4 = vector.load %arg2[%c0_1, %c0_2] : memref<2x32xf32, #tpu.memory_space<vmem>>, vector<2x32xf32>
    %c0_3 = arith.constant 0 : index
    %c0_4 = arith.constant 0 : index
    %5 = vector.load %arg3[%c0_3, %c0_4] : memref<1x32xf32, #tpu.memory_space<vmem>>, vector<1x32xf32>
    %c0_5 = arith.constant 0 : index
    %c0_6 = arith.constant 0 : index
    %6 = vector.load %arg4[%c0_5, %c0_6] : memref<32x32xf32, #tpu.memory_space<vmem>>, vector<32x32xf32>
    %c0_7 = arith.constant 0 : index
    %c0_8 = arith.constant 0 : index
    %7 = vector.load %arg5[%c0_7, %c0_8] : memref<1x32xf32, #tpu.memory_space<vmem>>, vector<1x32xf32>
    %8 = vector.extract_strided_slice %4 {offsets = [0, 0], sizes = [1, 32], strides = [1, 1]} : vector<2x32xf32> to vector<1x32xf32>
    %9 = vector.broadcast %1 : vector<8x1xf32> to vector<8x32xf32>
    %10 = vector.broadcast %8 : vector<1x32xf32> to vector<8x32xf32>
    %11 = arith.mulf %9, %10 : vector<8x32xf32>
    %12 = vector.extract_strided_slice %4 {offsets = [1, 0], sizes = [1, 32], strides = [1, 1]} : vector<2x32xf32> to vector<1x32xf32>
    %13 = vector.broadcast %2 : vector<8x1xf32> to vector<8x32xf32>
    %14 = vector.broadcast %12 : vector<1x32xf32> to vector<8x32xf32>
    %15 = arith.mulf %13, %14 : vector<8x32xf32>
    %16 = arith.addf %11, %15 : vector<8x32xf32>
    %17 = vector.broadcast %5 : vector<1x32xf32> to vector<8x32xf32>
    %18 = arith.addf %16, %17 : vector<8x32xf32>
    %cst = arith.constant 0.000000e+00 : f32
    %19 = vector.broadcast %cst : f32 to vector<8x32xf32>
    %20 = arith.maximumf %18, %19 : vector<8x32xf32>
    %cst_9 = arith.constant dense<0.000000e+00> : vector<8x32xf32>
    %21 = tpu.matmul %20, %6, %cst_9 {dimension_numbers = #tpu.dot_dimension_numbers<[1], [0], [0], [1], [0, 0, 1, 1], [], []>} : vector<8x32xf32>, vector<32x32xf32>, vector<8x32xf32> -> vector<8x32xf32>
    %22 = vector.broadcast %7 : vector<1x32xf32> to vector<8x32xf32>
    %23 = arith.addf %21, %22 : vector<8x32xf32>
    %c0_10 = arith.constant 0 : index
    %c0_11 = arith.constant 0 : index
    %24 = vector.load %arg7[%c0_10, %c0_11] : memref<8x32xf32, #tpu.memory_space<vmem>>, vector<8x32xf32>
    tpu.vector_store %arg7[%c0_10, %c0_11], %23 {strides = array<i32>} : memref<8x32xf32, #tpu.memory_space<vmem>>, vector<8x32xf32>,
    %25 = arith.addf %3, %23 : vector<8x32xf32>
    %c0_12 = arith.constant 0 : index
    %c0_13 = arith.constant 0 : index
    %26 = vector.load %arg6[%c0_12, %c0_13] : memref<8x32xf32, #tpu.memory_space<vmem>>, vector<8x32xf32>
    tpu.vector_store %arg6[%c0_12, %c0_13], %25 {strides = array<i32>} : memref<8x32xf32, #tpu.memory_space<vmem>>, vector<8x32xf32>,
    return
  }
  func.func @transform_0(%arg0: i32) -> (i32, i32) {
    %c0_i32 = arith.constant 0 : i32
    %c0_i32_0 = arith.constant 0 : i32
    return %arg0, %c0_i32 : i32, i32
  }
  func.func @transform_1(%arg0: i32) -> (i32, i32) {
    %c0_i32 = arith.constant 0 : i32
    %c0_i32_0 = arith.constant 0 : i32
    %c0_i32_1 = arith.constant 0 : i32
    return %c0_i32, %c0_i32_0 : i32, i32
  }
  func.func @transform_2(%arg0: i32) -> (i32, i32) {
    %c0_i32 = arith.constant 0 : i32
    %c0_i32_0 = arith.constant 0 : i32
    %c0_i32_1 = arith.constant 0 : i32
    return %c0_i32, %c0_i32_0 : i32, i32
  }
  func.func @transform_3(%arg0: i32) -> (i32, i32) {
    %c0_i32 = arith.constant 0 : i32
    %c0_i32_0 = arith.constant 0 : i32
    %c0_i32_1 = arith.constant 0 : i32
    return %c0_i32, %c0_i32_0 : i32, i32
  }
  func.func @transform_4(%arg0: i32) -> (i32, i32) {
    %c0_i32 = arith.constant 0 : i32
    %c0_i32_0 = arith.constant 0 : i32
    %c0_i32_1 = arith.constant 0 : i32
    return %c0_i32, %c0_i32_0 : i32, i32
  }
  func.func @transform_5(%arg0: i32) -> (i32, i32) {
    %c0_i32 = arith.constant 0 : i32
    %c0_i32_0 = arith.constant 0 : i32
    return %arg0, %c0_i32 : i32, i32
  }
  func.func @transform_6(%arg0: i32) -> (i32, i32) {
    %c0_i32 = arith.constant 0 : i32
    %c0_i32_0 = arith.constant 0 : i32
    return %arg0, %c0_i32 : i32, i32
  }
}

</mosaic_0001>

<bundles_post_ra>
// kernel: tpu_custom_call.1
= control target key start
LH: loop header
LB: loop body
LE: loop exit
PB: predicated region body
PF: predicated region fallthrough
CT: control target
= control target key end

     0   :  { %12 = vsyncpa [#allocation3], 0  ;;  %s1134_s0 = inlined_call_operand.hbm [shape: f32[16,34], index: 0, kind: input, shape index: {}]   ;;  %s1135_s1 = inlined_call_operand.vmem [shape: f32[2,32], index: 1, kind: input, shape index: {}]   ;;  %s1136_s2 = inlined_call_operand.vmem [shape: f32[1,32], index: 2, kind: input, shape index: {}]   ;;  %s1137_s3 = inlined_call_operand.hbm [shape: f32[32,32], index: 3, kind: input, shape index: {}]   ;;  %s1138_s4 = inlined_call_operand.vmem [shape: f32[1,32], index: 4, kind: input, shape index: {}]   ;;  %s1139_s5 = inlined_call_operand.hbm [shape: f32[16,32], index: 5, kind: output, shape index: {0}]   ;;  %s1140_s6 = inlined_call_operand.hbm [shape: f32[16,32], index: 6, kind: output, shape index: {1}]  }
   0x1   :  { %14 = vsyncpa [#allocation3 + $0x1], 0 }
   0x2   :  { %15 = vsyncpa [#allocation6], 0 }
   0x3   :  { %16 = vsyncpa [#allocation4], 0 }
   0x4   :  { %18 = vsyncpa [#allocation4 + $0x1], 0 }
   0x5   :  { %19 = vsyncpa [#allocation9], 0 }
   0x6   :  { %21 = vsyncpa [#allocation9 + $0x1], 0  ;;  %s889_s21 = smov 0   ;;  %s891_s22 = smov 0  }
   0x7   :  { %s893_s23 = smov 0   ;;  %s895_s24 = smov 0  }
   0x8 LB: > { %s910_s25 = sadd.s32 4294967295, %s839_s24   ;;  %s564_s26 = sadd.s32 4294967294, %s839_s24   ;;  %s839_s24 = sphi %s895_s24, %s1160_s24   ;;  %s835_s23 = sphi %s893_s23, %s1159_s23   ;;  %s831_s22 = sphi %s891_s22, %s1158_s22   ;;  %s827_s21 = sphi %s889_s21, %s1157_s21  }
   0x9   : > { %p47_p0 = scmp.ne.s32.totalorder %s831_s22, %s827_s21  ;;  %p1141_p1 = scmp.eq.s32.totalorder %s910_s25, 0 }
   0xa   : > { %p161_p3 = scmp.eq.s32.totalorder %s564_s26, 1  ;;  %p565_p5 = scmp.ge.s32.totalorder %s839_s24, 1 }
   0xb   : > { %p919_p4 = por %p1141_p1, %p47_p0  ;;  %p194_p7 = scmp.lt.s32.totalorder %s839_s24, 3 }
   0xc   : > { %p924_p6 = por %p161_p3, %p47_p0  ;;  %s841_s30 = smov [#allocation5]  }
   0xd   : > { %s1144_s27 = scalar_select %p919_p4, 1, 0 }
   0xe   : > { %s1145_s28 = scalar_select %p924_p6, 1, 0 }
   0xf   : > { %p929_p8 = pnand %p565_p5, %p194_p7  ;;  %s212_s7 = sshll.u32 %s841_s30, 4  ;;  %s933_s7 = int_to_ptr.vmem [resolvable:$true] %s212_s7 }
  0x10   : > { %s945_s9 = sadd.s32 1, %s839_s24   ;;  %s34_s10 = sadd.s32 1, %s835_s23 }
  0x11   : > { %s1146_s29 = scalar_select %p929_p8, 1, 0 }
  0x12   : > { %p616_p9 = pneg %p929_p8  ;;  %s31_s11 = ssub.s32 %s839_s24, %s945_s9 }
  0x13   : > { %s679_s14 = scalar_lea.hbm %s1137_s3, 512 }
  0x14   : > { %p940_p11 = pnand %p616_p9, %p1141_p1  ;;  %p680_p12 = scmp.ne.s32.totalorder %s1137_s3, %s679_s14 }
  0x15   : > { %p686_p5 = scmp.lt.u32.totalorder %s679_s14, %s1137_s3 }
  0x16   : > { %p681_p13 = pneg %p940_p11 }
  0x18   : > { %p682_p0 = pnand %p681_p13, %p680_p12 }
  0x1a   : > { %p683_p3 = pneg %p682_p0 }
  0x1c   : > { %p688_p7 = pnand %p686_p5, %p683_p3 }
  0x1e   : > { %691 = shalt.err (!%p688_p7)
}
  0x1f   : > { %s692_s19 = scalar_lea.vmem %s933_s7, 512  ;;  %p700_p2 = scmp.lt.s32.totalorder %s933_s7, %s933_s7 }
  0x20   : > { %p693_p9 = scmp.ne.s32.totalorder %s933_s7, %s692_s19  ;;  %p701_p6 = scmp.lt.s32.totalorder %s692_s19, %s692_s19 }
  0x22   : > { %p695_p10 = pnand %p693_p9, %p681_p13  ;;  %p702_p4 = por %p701_p6, %p700_p2 }
  0x24   : > { %p696_p1 = pneg %p695_p10 }
  0x26   : > { %p703_p8 = pnand %p702_p4, %p696_p1 }
  0x28   : > { %706 = shalt.err (!%p703_p8)
}
  0x29   : > { %s842_s20 = smov 128   ;;  %s843_s26 = smov 8  }
  0x2a   : > { %619 = dma.hbm_to_vmem [thread:$0]  (!%p940_p11), %s1137_s3, 512, %s933_s7, [#allocation6], %s842_s20, %s842_s20, %s843_s26  }
  0x2b   : > { %p32_p2 = scmp.eq.s32.totalorder %s31_s11, 0  ;;  %p41_p1 = scmp.ne.s32.totalorder %s835_s23, %s831_s22 }
  0x2c   : > { %p42_p4 = scmp.eq.s32.totalorder %s839_s24, 0  ;;  %p632_p6 = scmp.lt.s32.totalorder %s839_s24, 2 }
  0x2d   : > { %s976_s13 = scalar_select %p32_p2, %s835_s23, %s34_s10  }
  0x2e   : > { %p43_p8 = por %p42_p4, %p41_p1  ;;  %p1148_p10 = scmp.eq.s32.totalorder %s910_s25, 1 }
  0x2f   : > { %s229_s15 = sand.u32 1, %s835_s23   ;;  %s569_s16 = sshll.u32 %s839_s24, 7 }
  0x30   : > { %p980_p12 = por %p1148_p10, %p41_p1  ;;  %s568_s17 = sshll.u32 %s229_s15, 3 }
  0x31   : > { %s989_s19 = scalar_lea.hbm %s1134_s0, %s569_s16  ;;  %s233_s7 = scalar_lea.vmem [#allocation2], %s568_s17 }
  0x32   : > { %s240_s10 = sshll.u32 %s233_s7, 4  ;;  %p991_p11 = pnand %p632_p6, %p43_p8  ;;  %s995_s10 = int_to_ptr.vmem [resolvable:$true] %s240_s10 }
  0x33   : > { %s230_s20 = scalar_lea.sflag [#allocation3], %s229_s15  ;;  %s707_s26 = scalar_lea.hbm %s989_s19, 128 }
  0x34   : > { %p708_p13 = scmp.ne.s32.totalorder %s989_s19, %s707_s26  ;;  %p709_p0 = pneg %p991_p11 }
  0x35   : > { %s712_s16 = scalar_lea.hbm %s1134_s0, 256  ;;  %p713_p7 = scmp.lt.u32.totalorder %s989_s19, %s1134_s0 }
  0x36   : > { %p710_p3 = pnand %p709_p0, %p708_p13  ;;  %p714_p9 = scmp.lt.u32.totalorder %s712_s16, %s707_s26 }
  0x37   : > { %p716_p1 = scmp.lt.u32.totalorder %s707_s26, %s989_s19 }
  0x38   : > { %p711_p5 = pneg %p710_p3  ;;  %p715_p2 = por %p714_p9, %p713_p7 }
  0x3a   : > { %p717_p4 = por %p716_p1, %p715_p2 }
  0x3c   : > { %p718_p6 = pnand %p717_p4, %p711_p5 }
  0x3e   : > { %721 = shalt.err (!%p718_p6)
}
  0x3f   : > { %s722_s15 = scalar_lea.vmem %s995_s10, 128  ;;  %s844_s18 = smov [#allocation2]  }
  0x40   : > { %p723_p8 = scmp.ne.s32.totalorder %s995_s10, %s722_s15  ;;  %s727_s7 = sshll.u32 %s844_s18, 4  ;;  %s728_s7 = int_to_ptr.vmem [resolvable:$false] %s727_s7 }
  0x41   : > { %s729_s30 = scalar_lea.vmem %s728_s7, 256  ;;  %p730_p3 = scmp.lt.s32.totalorder %s995_s10, %s728_s7 }
  0x42   : > { %p725_p10 = pnand %p723_p8, %p709_p0  ;;  %p731_p7 = scmp.lt.s32.totalorder %s729_s30, %s722_s15 }
  0x44   : > { %p726_p13 = pneg %p725_p10  ;;  %p732_p9 = por %p731_p7, %p730_p3 }
  0x46   : > { %p733_p2 = pnand %p732_p9, %p726_p13 }
  0x48   : > { %736 = shalt.err (!%p733_p2)
}
  0x49   : > { %623 = dma.hbm_to_vmem [thread:$0]  (!%p991_p11), %s989_s19, 128, %s995_s10, %s230_s20  }
  0x4a   : > { %p1151_p5 = scmp.ne.s32.totalorder %s1146_s29, 0 }
  0x4b   : > { %s1025_s26 = sand.u32 (!%p1151_p5), 1, %s831_s22   ;;  %p1152_p0 = scmp.ne.s32.totalorder (!%p1151_p5), %s1144_s27, 0 }
  0x4c   : > { %249 = sbr.rel (%p1151_p5) target bundleno = 690 (0x2b2), region = 40  ;;  %s1028_s12 = sshll.u32 (!%p1151_p5), %s1025_s26, 3 }
  0x4d   : > { %s252_s16 = scalar_lea.sflag (!%p1151_p5), [#allocation3], %s1025_s26  ;;  %s255_s17 = scalar_lea.vmem (!%p1151_p5), [#allocation2], %s1028_s12 }
  0x53   : > { %810 = dma.done.wait (%p1152_p0), %s252_s16, 128  }
  0x54   : > { %812 = vsyncadd (%p1152_p0), %s252_s16, 4294967168  ;;  %p1153_p11 = scmp.eq.s32.totalorder %s910_s25, 0 }
  0x56   : > { %814 = dma.done.wait (%p1153_p11), [#allocation6], 512   ;;  %p1154_p1 = pmov %p1153_p11 }
  0x57   : > { %v845_v0 = vmov 0   ;;  %v1040_v1 = vld [vmem:[%s255_s17] sm:$0xff]  ;;  %v296_v2 = vld [vmem:[#allocation5] sm:$0xff]  ;;  %v297_v3 = vld [vmem:[#allocation5 + $0x8] sm:$0xff]  ;;  %v846_v4 = vmov 1   ;;  %v847_v6 = vmov 0.0|0.0   ;;  %v306_v11 = vlaneseq }
  0x58   : > { %816 = vsyncadd (%p1154_p1), [#allocation6], 4294966784  ;;  %677 = vset.pattern.permute.xlu0 %v845_v0  ;;  %v601_v5 = vpack.c.bf16 %v297_v3, %v296_v2  ;;  %600 = vmatprep.subr.bf16.mxu0 %v847_v6  ;;  %v298_v7 = vld [vmem:[#allocation5 + $0x10] sm:$0xff]  ;;  %v299_v8 = vld [vmem:[#allocation5 + $0x18] sm:$0xff]  ;;  %vm848_vm0 = vmmov 0   ;;  %v849_v10 = vmov 0.0  }
  0x59   : > { %303 = vperm.xlu0 %677, %v1040_v1   ;;  %v604_v9 = vpack.c.bf16 %v299_v8, %v298_v7  ;;  %597 = vmatprep.mubr.msk.f32.mxu0 %vm848_vm0, %v849_v10  ;;  %v307_v12 = vshrl.u32 %v306_v11, 7  ;;  %v294_v15 = vld [vmem:[%s1135_s1] sm:$0x3]  ;;  %vm335_vm1 = vcmask 261120   ;;  %s850_s8 = smov 2   ;;  %s292_s15 = scalar_lea.vmem [#allocation8], %s1028_s12 }
  0x5a   : > { %602 = vmatpush3.bf16.msra.mxu0 %v601_v5  ;;  %v575_v22 = vld [vmem:[%s1136_s2] ss:$0 sm:$0xff]  ;;  %s580_s18 = sshll.u32 %s910_s25, 7  ;;  %s452_s17 = sshll.u32 %s292_s15, 4  ;;  %s453_s17 = int_to_ptr.vmem [resolvable:$true] %s452_s17 }
  0x5b   : > { %603 = vmatprep.subr.bf16.mxu0 %v847_v6  ;;  %v308_v13 = vsub.s32 0, %v307_v12  ;;  %v317_v14 = vsub.s32 1, %v307_v12  ;;  %v576_v26 = vld [vmem:[%s1138_s4] ss:$0 sm:$0xff]  ;;  %s1062_s16 = scalar_lea.hbm %s1140_s6, %s580_s18  ;;  %s426_s27 = scalar_lea.sflag [#allocation9], %s1025_s26 }
  0x5c   : > { %s737_s29 = scalar_lea.vmem %s453_s17, 128  ;;  %s851_s19 = smov [#allocation8]  }
  0x5d   : > { %678 = vset.pattern.permute.xlu0 %v846_v4  ;;  %v309_v17 = vrot.slane %v294_v15, %v308_v13  ;;  %v318_v18 = vrot.slane %v294_v15, %v317_v14  ;;  %p738_p4 = scmp.ne.s32.totalorder %s453_s17, %s737_s29  ;;  %s741_s10 = sshll.u32 %s851_s19, 4  ;;  %s742_s10 = int_to_ptr.vmem [resolvable:$false] %s741_s10 }
  0x5e   : > { %312 = vperm.xlu0 %678, %v1040_v1   ;;  %605 = vmatpush3.bf16.msra.mxu0 %v604_v9  ;;  %s743_s11 = scalar_lea.vmem %s742_s10, 256  ;;  %p744_p10 = scmp.lt.s32.totalorder %s453_s17, %s742_s10 }
  0x5f   : > { %p739_p6 = pnand %p738_p4, %p980_p12  ;;  %p745_p13 = scmp.lt.s32.totalorder %s743_s11, %s737_s29 }
  0x61   : > { %p740_p8 = pneg %p739_p6  ;;  %p746_p3 = por %p745_p13, %p744_p10 }
  0x63   : > { %p747_p7 = pnand %p746_p3, %p740_p8 }
  0xd8   : > { %v304_v16 = vpop.permute.xlu0 %303 }
  0xd9   : > { %v310_v20 = vmul.f32 %v309_v17, %v304_v16 }
  0xdd   : > { %v313_v19 = vpop.permute.xlu0 %312 }
  0xde   : > { %v319_v21 = vmul.f32 %v318_v18, %v313_v19 }
  0xe0   : > { %v320_v23 = vadd.f32 %v319_v21, %v310_v20 }
  0xe2   : > { %v327_v24 = vadd.f32 %v575_v22, %v320_v23 }
  0xe4   : > { %v328_v25 = vmax.f32 %v327_v24, 0.0 }
  0xe6   : > { %598 = vmatmul.mubr.msk.f32.vlgmr.msra.gmra.mrb[0].mxu0 %vm335_vm1, %v328_v25 }
 0x1b9   : > { %v405_v27 = vpop.f32.mrb[0].mxu0 }
 0x1ba   : > { %v406_v28 = vadd.f32 %v576_v26, %v405_v27  ;;  %v599_v29 = vpop.f32.mrb[1].mxu0 }
 0x1bc   : > { %411 = vrot.lane.b32.xlu1 %v406_v28, %s850_s8  ;;  %409 = vst.msk [vmem:[%s292_s15] sm:$0xff] %vm335_vm1, %v406_v28 }
 0x1bd   : > { %750 = shalt.err (!%p747_p7)
}
 0x1be   : > { %s751_s20 = scalar_lea.hbm %s1062_s16, 128  ;;  %s755_s7 = scalar_lea.hbm %s1140_s6, 256 }
 0x1bf   : > { %p752_p9 = scmp.ne.s32.totalorder %s1062_s16, %s751_s20  ;;  %p756_p0 = scmp.lt.u32.totalorder %s1062_s16, %s1140_s6 }
 0x1c0   : > { %p757_p11 = scmp.lt.u32.totalorder %s755_s7, %s751_s20  ;;  %p759_p4 = scmp.lt.u32.totalorder %s751_s20, %s1062_s16 }
 0x1c1   : > { %p753_p2 = pnand %p752_p9, %p980_p12 }
 0x1c2   : > { %p758_p1 = por %p757_p11, %p756_p0 }
 0x1c3   : > { %p754_p5 = pneg %p753_p2 }
 0x1c4   : > { %p760_p6 = por %p759_p4, %p758_p1 }
 0x1c6   : > { %p761_p8 = pnand %p760_p6, %p754_p5 }
 0x1c8   : > { %764 = shalt.err (!%p761_p8)
}
 0x1c9   : > { %613 = dma.vmem_to_hbm [thread:$0]  (%p980_p12), %s453_s17, 128, %s1062_s16, %s426_s27  }
 0x1ca   : > { %s852_s29 = smov 126   ;;  %s285_s10 = scalar_lea.vmem [#allocation7], %s1028_s12 }
 0x1cb   : > { %s439_s11 = sshll.u32 %s285_s10, 4  ;;  %s1089_s15 = scalar_lea.hbm %s1139_s5, %s580_s18  ;;  %s1091_s11 = int_to_ptr.vmem [resolvable:$true] %s439_s11 }
 0x1cc   : > { %s421_s16 = scalar_lea.sflag [#allocation4], %s1025_s26  ;;  %s765_s17 = scalar_lea.vmem %s1091_s11, 128 }
 0x1cd   : > { %p766_p10 = scmp.ne.s32.totalorder %s1091_s11, %s765_s17  ;;  %s853_s25 = smov [#allocation7]  }
 0x1ce   : > { %s769_s12 = sshll.u32 %s853_s25, 4  ;;  %s770_s12 = int_to_ptr.vmem [resolvable:$false] %s769_s12 }
 0x1cf   : > { %p767_p13 = pnand %p766_p10, %p980_p12  ;;  %s771_s27 = scalar_lea.vmem %s770_s12, 256 }
 0x1d0   : > { %p772_p7 = scmp.lt.s32.totalorder %s1091_s11, %s770_s12  ;;  %p773_p9 = scmp.lt.s32.totalorder %s771_s27, %s765_s17 }
 0x1d1   : > { %p768_p3 = pneg %p767_p13 }
 0x1d2   : > { %p774_p2 = por %p773_p9, %p772_p7 }
 0x1d4   : > { %p775_p5 = pnand %p774_p2, %p768_p3 }
 0x22e   : > { %v412_v30 = vpop.permute.xlu1 %411 }
 0x22f   : > { %v414_v31 = vadd.f32 %v412_v30, %v1040_v1 }
 0x231   : > { %416 = vrot.lane.b32.xlu1 %v414_v31, %s852_s29 }
 0x2a3   : > { %v417_v32 = vpop.permute.xlu1 %416 }
 0x2a4   : > { %419 = vst.msk [vmem:[%s285_s10] sm:$0xff] %vm335_vm1, %v417_v32 }
 0x2a5   : > { %778 = shalt.err (!%p775_p5)
}
 0x2a6   : > { %s779_s26 = scalar_lea.hbm %s1089_s15, 128  ;;  %s783_s30 = scalar_lea.hbm %s1139_s5, 256 }
 0x2a7   : > { %p780_p0 = scmp.ne.s32.totalorder %s1089_s15, %s779_s26  ;;  %p784_p4 = scmp.lt.u32.totalorder %s1089_s15, %s1139_s5 }
 0x2a8   : > { %p785_p6 = scmp.lt.u32.totalorder %s783_s30, %s779_s26  ;;  %p787_p10 = scmp.lt.u32.totalorder %s779_s26, %s1089_s15 }
 0x2a9   : > { %p781_p11 = pnand %p780_p0, %p980_p12 }
 0x2aa   : > { %p786_p8 = por %p785_p6, %p784_p4 }
 0x2ab   : > { %p782_p1 = pneg %p781_p11 }
 0x2ac   : > { %p788_p13 = por %p787_p10, %p786_p8 }
 0x2ae   : > { %p789_p3 = pnand %p788_p13, %p782_p1 }
 0x2b0   : > { %792 = shalt.err (!%p789_p3)
}
 0x2b1   : > { %612 = dma.vmem_to_hbm [thread:$0]  (%p980_p12), %s1091_s11, 128, %s1089_s15, %s421_s16  }
 0x2b2 PF: > { %s464_s10 = sand.u32 1, %s827_s21   ;;  %p1155_p7 = scmp.ne.s32.totalorder %s1145_s28, 0 }
 0x2b3   : > { %p1156_p9 = scmp.ge.s32.totalorder %s839_s24, 2  ;;  %s465_s20 = scalar_lea.sflag [#allocation4], %s464_s10 }
 0x2b5   : > { %p625_p2 = pnand %p1156_p9, %p1155_p7 }
 0x2b7   : > { %818 = dma.done.wait (!%p625_p2), %s465_s20, 128  }
 0x2b8   : > { %820 = vsyncadd (!%p625_p2), %s465_s20, 4294967168  ;;  %s474_s8 = scalar_lea.sflag [#allocation9], %s464_s10 }
 0x2b9   : > { %822 = dma.done.wait (!%p625_p2), %s474_s8, 128  }
 0x2ba   : > { %824 = vsyncadd (!%p625_p2), %s474_s8, 4294967168  ;;  %p24_p12 = scmp.ge.s32.totalorder %s945_s9, 4   ;;  %s1157_s21 = smov %s831_s22 }
 0x2bb   : > { %s1158_s22 = smov %s835_s23  ;;  %s1159_s23 = smov %s976_s13 }
 0x2bc   : > { %s1160_s24 = smov %s945_s9  ;;  %26 = sbr.rel (!%p24_p12) target bundleno = 8 (0x8), region = 106 }
 0x2c3   :  { %479 = vsyncpa [#allocation3], 1 }
 0x2c4   :  { %481 = vsyncpa [#allocation3 + $0x1], 1 }
 0x2c5   :  { %482 = vsyncpa [#allocation6], 1 }
 0x2c6   :  { %483 = vsyncpa [#allocation4], 1 }
 0x2c7   :  { %485 = vsyncpa [#allocation4 + $0x1], 1 }
 0x2c8   :  { %486 = vsyncpa [#allocation9], 1 }
 0x2c9   :  { %488 = vsyncpa [#allocation9 + $0x1], 1 }

</bundles_post_ra>
